<compile_context>
chip_gen: v7x
topology: tpu7x:2x2x1
jax: 0.10.0
libtpu: 0.0.40
codegen_flags: <defaults>
</compile_context>

<pallas_src>
import functools

import jax
import jax.numpy as jnp
from jax.experimental import pallas as pl
from jax.experimental.pallas import tpu as pltpu


def _ffn_kernel(x_ref, w1_ref, b1_ref, w2_ref, b2_ref, o_ref, acc_ref):
    # x_ref : (tm, D)    current token tile
    # w1_ref: (D, tf)    slice of linear_1 weight (already transposed to D x F)
    # b1_ref: (1, tf)    slice of linear_1 bias
    # w2_ref: (tf, D)    slice of linear_2 weight (F x D)
    # b2_ref: (1, D)     linear_2 bias
    # o_ref : (tm, D)    output tile
    # acc_ref: (tm, D) f32 accumulator, persistent across the ff (reduction) axis
    j = pl.program_id(1)

    @pl.when(j == 0)
    def _init():
        acc_ref[...] = jnp.zeros_like(acc_ref)

    # linear_1 slice on the MXU, f32 accumulation
    h = jnp.dot(x_ref[...], w1_ref[...], preferred_element_type=jnp.float32)
    # bias + ReLU on the VPU
    h = jnp.maximum(h + b1_ref[...], 0.0)
    # TODO(synk): training-mode dropout (pltpu.prng_seed + prng_random_bits mask);
    # forward here matches the module in eval mode where nn.Dropout is identity.

    # partial linear_2: accumulate over ff blocks
    acc_ref[...] += jnp.dot(h.astype(w2_ref.dtype), w2_ref[...],
                            preferred_element_type=jnp.float32)

    @pl.when(j == pl.num_programs(1) - 1)
    def _finalize():
        o_ref[...] = (acc_ref[...] + b2_ref[...]).astype(o_ref.dtype)


def feed_forward(x, w1, b1, w2, b2, *, block_tokens=256, block_ff=512):
    """Pallas equivalent of FeedForward.forward (dropout in eval mode).

    x : (..., model_dim)
    w1: (model_dim, ff_dim)   (i.e. linear_1.weight.T)
    b1: (ff_dim,)
    w2: (ff_dim, model_dim)   (i.e. linear_2.weight.T)
    b2: (model_dim,)
    """
    *lead, D = x.shape
    F = w1.shape[1]
    assert w1.shape == (D, F) and w2.shape == (F, D)
    N = 1
    for s in lead:
        N *= s
    x2 = x.reshape(N, D)
    b1r = b1.reshape(1, F)
    b2r = b2.reshape(1, D)

    # token tile: prefer a large lane/sublane-friendly tile; fall back to full N
    tm = block_tokens if (N % block_tokens == 0) else N
    # ff tile (reduction axis): prefer a 128-multiple tile; fall back to full F
    tf = block_ff if (F % block_ff == 0) else F

    out = pl.pallas_call(
        _ffn_kernel,
        out_shape=jax.ShapeDtypeStruct((N, D), x.dtype),
        grid_spec=pltpu.PrefetchScalarGridSpec(
            num_scalar_prefetch=0,
            grid=(N // tm, F // tf),
            in_specs=[
                pl.BlockSpec((tm, D), lambda i, j: (i, 0)),   # x tile
                pl.BlockSpec((D, tf), lambda i, j: (0, j)),   # W1 slice
                pl.BlockSpec((1, tf), lambda i, j: (0, j)),   # b1 slice
                pl.BlockSpec((tf, D), lambda i, j: (j, 0)),   # W2 slice
                pl.BlockSpec((1, D), lambda i, j: (0, 0)),    # b2
            ],
            out_specs=pl.BlockSpec((tm, D), lambda i, j: (i, 0)),
            scratch_shapes=[pltpu.VMEM((tm, D), jnp.float32)],
        ),
        compiler_params=pltpu.CompilerParams(
            dimension_semantics=("parallel", "arbitrary"),
            vmem_limit_bytes=64 * 1024 * 1024,
        ),
    )(x2, w1, b1r, w2, b2r)
    return out.reshape(*lead, D)


if __name__ == "__main__":
    model_dim = 32
    ff_dim = 64
    batch, seq = 2, 8

    key = jax.random.PRNGKey(0)
    k_x, k_w1, k_b1, k_w2, k_b2 = jax.random.split(key, 5)
    x = jax.random.normal(k_x, (batch, seq, model_dim), dtype=jnp.float32)
    # deterministic "weights" (math layout: in_dim x out_dim, i.e. torch weight.T)
    w1 = jax.random.normal(k_w1, (model_dim, ff_dim), dtype=jnp.float32) * 0.1
    b1 = jax.random.normal(k_b1, (ff_dim,), dtype=jnp.float32) * 0.1
    w2 = jax.random.normal(k_w2, (ff_dim, model_dim), dtype=jnp.float32) * 0.1
    b2 = jax.random.normal(k_b2, (model_dim,), dtype=jnp.float32) * 0.1

    out = feed_forward(x, w1, b1, w2, b2)
    out = jax.block_until_ready(out)

    # reference: relu(x @ W1 + b1) @ W2 + b2  (dropout is identity in eval mode)
    h_ref = jnp.maximum(jnp.einsum("bsd,df->bsf", x, w1) + b1, 0.0)
    ref = jnp.einsum("bsf,fd->bsd", h_ref, w2) + b2

    assert out.shape == (batch, seq, model_dim)
    assert jnp.allclose(out, ref, atol=1e-5, rtol=1e-5)

    print("KERNEL_OK")
</pallas_src>

<mosaic_0001>
module attributes {stable_mosaic.version = 11 : i64} {
  func.func @_ffn_kernel(%arg0: i32, %arg1: i32, %arg2: memref<16x32xf32, #tpu.memory_space<vmem>>, %arg3: memref<32x64xf32, #tpu.memory_space<vmem>>, %arg4: memref<1x64xf32, #tpu.memory_space<vmem>>, %arg5: memref<64x32xf32, #tpu.memory_space<vmem>>, %arg6: memref<1x32xf32, #tpu.memory_space<vmem>>, %arg7: memref<16x32xf32, #tpu.memory_space<vmem>>, %arg8: memref<16x32xf32, #tpu.memory_space<vmem>>) attributes {dimension_semantics = [#tpu.dimension_semantics<parallel>, #tpu.dimension_semantics<arbitrary>], iteration_bounds = array<i64: 1, 1>, scalar_prefetch = 0 : i64, scratch_operands = 1 : i64, tpu.core_type = #tpu.core_type<tc>, window_params = [{transform_indices = @transform_0, window_bounds = array<i64: 16, 32>}, {transform_indices = @transform_1, window_bounds = array<i64: 32, 64>}, {transform_indices = @transform_2, window_bounds = array<i64: 1, 64>}, {transform_indices = @transform_3, window_bounds = array<i64: 64, 32>}, {pipeline_mode = #tpu.pipeline_mode<synchronous>, transform_indices = @transform_4, window_bounds = array<i64: 1, 32>}, {transform_indices = @transform_5, window_bounds = array<i64: 16, 32>}]} {
    %c0_i32 = arith.constant 0 : i32
    %0 = arith.cmpi eq, %arg1, %c0_i32 : i32
    %1 = arith.extui %0 : i1 to i32
    %c0_i32_0 = arith.constant 0 : i32
    %2 = arith.cmpi ne, %1, %c0_i32_0 : i32
    scf.if %2 {
      %cst_16 = arith.constant 0.000000e+00 : f32
      %19 = vector.broadcast %cst_16 : f32 to vector<16x32xf32>
      %c0_17 = arith.constant 0 : index
      %c0_18 = arith.constant 0 : index
      %20 = vector.load %arg8[%c0_17, %c0_18] : memref<16x32xf32, #tpu.memory_space<vmem>>, vector<16x32xf32>
      tpu.vector_store %arg8[%c0_17, %c0_18], %19 {strides = array<i32>} : memref<16x32xf32, #tpu.memory_space<vmem>>, vector<16x32xf32>,
    } else {
    }
    %c0 = arith.constant 0 : index
    %c0_1 = arith.constant 0 : index
    %3 = vector.load %arg2[%c0, %c0_1] : memref<16x32xf32, #tpu.memory_space<vmem>>, vector<16x32xf32>
    %c0_2 = arith.constant 0 : index
    %c0_3 = arith.constant 0 : index
    %4 = vector.load %arg3[%c0_2, %c0_3] : memref<32x64xf32, #tpu.memory_space<vmem>>, vector<32x64xf32>
    %cst = arith.constant dense<0.000000e+00> : vector<16x64xf32>
    %5 = tpu.matmul %3, %4, %cst {dimension_numbers = #tpu.dot_dimension_numbers<[1], [0], [0], [1], [0, 0, 1, 1], [], []>} : vector<16x32xf32>, vector<32x64xf32>, vector<16x64xf32> -> vector<16x64xf32>
    %c0_4 = arith.constant 0 : index
    %c0_5 = arith.constant 0 : index
    %6 = vector.load %arg4[%c0_4, %c0_5] : memref<1x64xf32, #tpu.memory_space<vmem>>, vector<1x64xf32>
    %7 = vector.broadcast %6 : vector<1x64xf32> to vector<16x64xf32>
    %8 = arith.addf %5, %7 : vector<16x64xf32>
    %cst_6 = arith.constant 0.000000e+00 : f32
    %9 = vector.broadcast %cst_6 : f32 to vector<16x64xf32>
    %10 = arith.maximumf %8, %9 : vector<16x64xf32>
    %c0_7 = arith.constant 0 : index
    %c0_8 = arith.constant 0 : index
    %11 = vector.load %arg8[%c0_7, %c0_8] : memref<16x32xf32, #tpu.memory_space<vmem>>, vector<16x32xf32>
    %c0_9 = arith.constant 0 : index
    %c0_10 = arith.constant 0 : index
    %12 = vector.load %arg5[%c0_9, %c0_10] : memref<64x32xf32, #tpu.memory_space<vmem>>, vector<64x32xf32>
    %cst_11 = arith.constant dense<0.000000e+00> : vector<16x32xf32>
    %13 = tpu.matmul %10, %12, %cst_11 {dimension_numbers = #tpu.dot_dimension_numbers<[1], [0], [0], [1], [0, 0, 1, 1], [], []>} : vector<16x64xf32>, vector<64x32xf32>, vector<16x32xf32> -> vector<16x32xf32>
    %14 = arith.addf %11, %13 : vector<16x32xf32>
    %c0_12 = arith.constant 0 : index
    %c0_13 = arith.constant 0 : index
    %15 = vector.load %arg8[%c0_12, %c0_13] : memref<16x32xf32, #tpu.memory_space<vmem>>, vector<16x32xf32>
    tpu.vector_store %arg8[%c0_12, %c0_13], %14 {strides = array<i32>} : memref<16x32xf32, #tpu.memory_space<vmem>>, vector<16x32xf32>,
    %c0_i32_14 = arith.constant 0 : i32
    %16 = arith.cmpi eq, %arg1, %c0_i32_14 : i32
    %17 = arith.extui %16 : i1 to i32
    %c0_i32_15 = arith.constant 0 : i32
    %18 = arith.cmpi ne, %17, %c0_i32_15 : i32
    scf.if %18 {
      %c0_16 = arith.constant 0 : index
      %c0_17 = arith.constant 0 : index
      %19 = vector.load %arg8[%c0_16, %c0_17] : memref<16x32xf32, #tpu.memory_space<vmem>>, vector<16x32xf32>
      %c0_18 = arith.constant 0 : index
      %c0_19 = arith.constant 0 : index
      %20 = vector.load %arg6[%c0_18, %c0_19] : memref<1x32xf32, #tpu.memory_space<vmem>>, vector<1x32xf32>
      %21 = vector.broadcast %20 : vector<1x32xf32> to vector<16x32xf32>
      %22 = arith.addf %19, %21 : vector<16x32xf32>
      %c0_20 = arith.constant 0 : index
      %c0_21 = arith.constant 0 : index
      %23 = vector.load %arg7[%c0_20, %c0_21] : memref<16x32xf32, #tpu.memory_space<vmem>>, vector<16x32xf32>
      tpu.vector_store %arg7[%c0_20, %c0_21], %22 {strides = array<i32>} : memref<16x32xf32, #tpu.memory_space<vmem>>, vector<16x32xf32>,
    } else {
    }
    return
  }
  func.func @transform_0(%arg0: i32, %arg1: i32) -> (i32, i32) {
    %c0_i32 = arith.constant 0 : i32
    %c0_i32_0 = arith.constant 0 : i32
    return %arg0, %c0_i32 : i32, i32
  }
  func.func @transform_1(%arg0: i32, %arg1: i32) -> (i32, i32) {
    %c0_i32 = arith.constant 0 : i32
    %c0_i32_0 = arith.constant 0 : i32
    return %c0_i32, %arg1 : i32, i32
  }
  func.func @transform_2(%arg0: i32, %arg1: i32) -> (i32, i32) {
    %c0_i32 = arith.constant 0 : i32
    %c0_i32_0 = arith.constant 0 : i32
    return %c0_i32, %arg1 : i32, i32
  }
  func.func @transform_3(%arg0: i32, %arg1: i32) -> (i32, i32) {
    %c0_i32 = arith.constant 0 : i32
    %c0_i32_0 = arith.constant 0 : i32
    return %arg1, %c0_i32 : i32, i32
  }
  func.func @transform_4(%arg0: i32, %arg1: i32) -> (i32, i32) {
    %c0_i32 = arith.constant 0 : i32
    %c0_i32_0 = arith.constant 0 : i32
    %c0_i32_1 = arith.constant 0 : i32
    return %c0_i32, %c0_i32_0 : i32, i32
  }
  func.func @transform_5(%arg0: i32, %arg1: i32) -> (i32, i32) {
    %c0_i32 = arith.constant 0 : i32
    %c0_i32_0 = arith.constant 0 : i32
    return %arg0, %c0_i32 : i32, i32
  }
}

</mosaic_0001>

<bundles_post_ra>
// kernel: tpu_custom_call.1
= control target key start
LH: loop header
LB: loop body
LE: loop exit
PB: predicated region body
PF: predicated region fallthrough
CT: control target
= control target key end

     0   :  { %10 = vsyncpa [#allocation4], 0  ;;  %s683_s0 = inlined_call_operand.hbm [shape: f32[16,32], index: 0, kind: input, shape index: {}]   ;;  %s684_s1 = inlined_call_operand.hbm [shape: f32[32,64], index: 1, kind: input, shape index: {}]   ;;  %s685_s2 = inlined_call_operand.hbm [shape: f32[1,64], index: 2, kind: input, shape index: {}]   ;;  %s686_s3 = inlined_call_operand.hbm [shape: f32[64,32], index: 3, kind: input, shape index: {}]   ;;  %s687_s4 = inlined_call_operand.hbm [shape: f32[1,32], index: 4, kind: input, shape index: {}]   ;;  %s688_s5 = inlined_call_operand.hbm [shape: f32[16,32], index: 5, kind: output, shape index: {}]  }
   0x1   :  { %11 = vsyncpa [#allocation7], 0 }
   0x2   :  { %12 = vsyncpa [#allocation10], 0 }
   0x3   :  { %13 = vsyncpa [#allocation5], 0  ;;  %s545_s18 = smov [#allocation6]   ;;  %s546_s20 = smov [#allocation9]  }
   0x4   :  { %s31_s19 = sshll.u32 %s545_s18, 4  ;;  %s53_s21 = sshll.u32 %s546_s20, 4  ;;  %s32_s19 = int_to_ptr.vmem [resolvable:$true] %s31_s19  ;;  %s584_s21 = int_to_ptr.vmem [resolvable:$true] %s53_s21 }
   0x5   :  { %s405_s24 = scalar_lea.hbm %s684_s1, 512 }
   0x6   :  { %p406_p0 = scmp.ne.s32.totalorder %s684_s1, %s405_s24  ;;  %p409_p1 = scmp.lt.u32.totalorder %s405_s24, %s684_s1 }
   0x8   :  { %p411_p2 = pnand %p409_p1, %p406_p0 }
   0xa   :  { %414 = shalt.err (!%p411_p2)
}
   0xb   :  { %s415_s29 = scalar_lea.vmem %s32_s19, 512  ;;  %p420_p4 = scmp.lt.s32.totalorder %s32_s19, %s32_s19 }
   0xc   :  { %p416_p3 = scmp.ne.s32.totalorder %s32_s19, %s415_s29  ;;  %p421_p5 = scmp.lt.s32.totalorder %s415_s29, %s415_s29 }
   0xe   :  { %p422_p6 = por %p421_p5, %p420_p4 }
  0x10   :  { %p423_p7 = pnand %p422_p6, %p416_p3 }
  0x12   :  { %426 = shalt.err (!%p423_p7)
}
  0x13   :  { %s547_s30 = smov 128   ;;  %s548_s6 = smov 8  }
  0x14   :  { %37 = dma.hbm_to_vmem [thread:$0]  %s684_s1, 512, %s32_s19, [#allocation7], %s547_s30, %s547_s30, %s548_s6  }
  0x15   :  { %s427_s11 = scalar_lea.hbm %s686_s3, 1024 }
  0x16   :  { %p428_p8 = scmp.ne.s32.totalorder %s686_s3, %s427_s11  ;;  %p431_p9 = scmp.lt.u32.totalorder %s427_s11, %s686_s3 }
  0x18   :  { %p433_p10 = pnand %p431_p9, %p428_p8 }
  0x1a   :  { %436 = shalt.err (!%p433_p10)
}
  0x1b   :  { %s437_s16 = scalar_lea.vmem %s584_s21, 1024  ;;  %p442_p12 = scmp.lt.s32.totalorder %s584_s21, %s584_s21 }
  0x1c   :  { %p438_p11 = scmp.ne.s32.totalorder %s584_s21, %s437_s16  ;;  %p443_p13 = scmp.lt.s32.totalorder %s437_s16, %s437_s16 }
  0x1e   :  { %p444_p0 = por %p443_p13, %p442_p12 }
  0x20   :  { %p445_p1 = pnand %p444_p0, %p438_p11 }
  0x22   :  { %448 = shalt.err (!%p445_p1)
}
  0x23   :  { %59 = dma.hbm_to_vmem [thread:$0]  %s686_s3, 1024, %s584_s21, [#allocation10], %s547_s30, %s547_s30, %s548_s6  }
  0x24   :  { %s549_s18 = smov [#allocation3]   ;;  %s550_s20 = smov [#allocation8]  }
  0x25   :  { %s19_s19 = sshll.u32 %s549_s18, 4  ;;  %s44_s22 = sshll.u32 %s550_s20, 4  ;;  %s20_s19 = int_to_ptr.vmem [resolvable:$true] %s19_s19  ;;  %s45_s22 = int_to_ptr.vmem [resolvable:$true] %s44_s22 }
  0x26   :  { %s449_s25 = scalar_lea.hbm %s683_s0, 256 }
  0x27   :  { %p450_p2 = scmp.ne.s32.totalorder %s683_s0, %s449_s25  ;;  %p453_p3 = scmp.lt.u32.totalorder %s449_s25, %s683_s0 }
  0x29   :  { %p455_p4 = pnand %p453_p3, %p450_p2 }
  0x2b   :  { %458 = shalt.err (!%p455_p4)
}
  0x2c   :  { %s459_s3 = scalar_lea.vmem %s20_s19, 256  ;;  %p464_p6 = scmp.lt.s32.totalorder %s20_s19, %s20_s19 }
  0x2d   :  { %p460_p5 = scmp.ne.s32.totalorder %s20_s19, %s459_s3  ;;  %p465_p7 = scmp.lt.s32.totalorder %s459_s3, %s459_s3 }
  0x2f   :  { %p466_p8 = por %p465_p7, %p464_p6 }
  0x31   :  { %p467_p9 = pnand %p466_p8, %p460_p5 }
  0x33   :  { %470 = shalt.err (!%p467_p9)
}
  0x34   :  { %25 = dma.hbm_to_vmem [thread:$0]  %s683_s0, 256, %s20_s19, [#allocation4], %s547_s30, %s547_s30, %s548_s6  }
  0x35   :  { %s471_s10 = scalar_lea.hbm %s685_s2, 16 }
  0x36   :  { %p472_p10 = scmp.ne.s32.totalorder %s685_s2, %s471_s10  ;;  %p475_p11 = scmp.lt.u32.totalorder %s471_s10, %s685_s2 }
  0x38   :  { %p477_p12 = pnand %p475_p11, %p472_p10 }
  0x3a   :  { %480 = shalt.err (!%p477_p12)
}
  0x3b   :  { %s481_s15 = scalar_lea.vmem %s45_s22, 16  ;;  %s485_s16 = scalar_lea.vmem %s45_s22, 32 }
  0x3c   :  { %p482_p13 = scmp.ne.s32.totalorder %s45_s22, %s481_s15  ;;  %p486_p0 = scmp.lt.s32.totalorder %s45_s22, %s45_s22 }
  0x3d   :  { %p487_p1 = scmp.lt.s32.totalorder %s485_s16, %s481_s15 }
  0x3f   :  { %p488_p2 = por %p487_p1, %p486_p0 }
  0x41   :  { %p489_p3 = pnand %p488_p2, %p482_p13 }
  0x43   :  { %492 = shalt.err (!%p489_p3)
}
  0x44   :  { %47 = dma.hbm_to_vmem [thread:$0]  %s685_s2, 16, %s45_s22, [#allocation7]  }
  0x45   :  { %s551_s17 = smov [#allocation11]   ;;  %s493_s23 = scalar_lea.hbm %s687_s4, 16 }
  0x46   :  { %s66_s18 = sshll.u32 %s551_s17, 4  ;;  %p494_p4 = scmp.ne.s32.totalorder %s687_s4, %s493_s23  ;;  %s67_s18 = int_to_ptr.vmem [resolvable:$true] %s66_s18 }
  0x47   :  { %p497_p5 = scmp.lt.u32.totalorder %s493_s23, %s687_s4 }
  0x49   :  { %p499_p6 = pnand %p497_p5, %p494_p4 }
  0x4b   :  { %502 = shalt.err (!%p499_p6)
}
  0x4c   :  { %s503_s28 = scalar_lea.vmem %s67_s18, 16  ;;  %s507_s2 = scalar_lea.vmem %s67_s18, 32 }
  0x4d   :  { %p504_p7 = scmp.ne.s32.totalorder %s67_s18, %s503_s28  ;;  %p508_p8 = scmp.lt.s32.totalorder %s67_s18, %s67_s18 }
  0x4e   :  { %p509_p9 = scmp.lt.s32.totalorder %s507_s2, %s503_s28 }
  0x50   :  { %p510_p10 = por %p509_p9, %p508_p8 }
  0x52   :  { %p511_p11 = pnand %p510_p10, %p504_p7 }
  0x54   :  { %514 = shalt.err (!%p511_p11)
}
  0x55   :  { %69 = dma.hbm_to_vmem [thread:$0]  %s687_s4, 16, %s67_s18, [#allocation10]  }
  0x56   :  { %537 = dma.done.wait [#allocation4], 256  }
  0x57   :  { %538 = vsyncadd [#allocation4], 4294967040 }
  0x58   :  { %539 = dma.done.wait [#allocation7], 528  }
  0x59   :  { %540 = vsyncadd [#allocation7], 4294966768 }
  0x5a   :  { %541 = dma.done.wait [#allocation10], 1040  }
  0x5b   :  { %542 = vsyncadd [#allocation10], 4294966256  ;;  %vm89_vm0 = vcmask 261120   ;;  %v94_v0 = vld [vmem:[#allocation6] sm:$0xff]  ;;  %v95_v1 = vld [vmem:[#allocation6 + $0x8] sm:$0xff]  ;;  %v552_v20 = vmov 0.0  }
  0x5c   :  { %v96_v2 = vld [vmem:[#allocation6 + $0x10] sm:$0xff]  ;;  %v372_v3 = vpack.c.bf16 %v95_v1, %v94_v0  ;;  %v97_v4 = vld [vmem:[#allocation6 + $0x18] sm:$0xff]  ;;  %v191_v7 = vld [vmem:[#allocation9] sm:$0xff]  ;;  %91 = vst.msk [vmem:[#allocation2 + $0x8] sm:$0xff] %vm89_vm0, %v552_v20  ;;  %vm199_vm1 = vcmask 523264   ;;  %s553_s4 = smov [#allocation12]  }
  0x5d   :  { %v92_v5 = vld [vmem:[#allocation3] sm:$0xff]  ;;  %v376_v6 = vpack.c.bf16 %v97_v4, %v96_v2  ;;  %v194_v11 = vld [vmem:[#allocation9 + $0x18] sm:$0xff]  ;;  %v195_v13 = vld [vmem:[#allocation9 + $0x20] sm:$0xff]  ;;  %90 = vst.msk [vmem:[#allocation2] sm:$0xff] %vm89_vm0, %v552_v20  ;;  %s306_s3 = sshll.u32 %s553_s4, 4  ;;  %s307_s3 = int_to_ptr.vmem [resolvable:$true] %s306_s3 }
  0x5e   :  { %350 = vmatprep.mubr.msk.f32.mxu0 %vm89_vm0, %v92_v5  ;;  %v192_v8 = vld [vmem:[#allocation9 + $0x8] sm:$0xff]  ;;  %v193_v9 = vld [vmem:[#allocation9 + $0x10] sm:$0xff]  ;;  %373 = vmatprep.subr.bf16.mxu0 %v372_v3  ;;  %v198_v18 = vld [vmem:[#allocation9 + $0x38] sm:$0xff]  ;;  %s515_s21 = scalar_lea.vmem %s307_s3, 256  ;;  %p520_p13 = scmp.lt.s32.totalorder %s307_s3, %s307_s3 }
  0x5f   :  { %v380_v10 = vpack.c.bf16 %v192_v8, %v191_v7  ;;  %375 = vmatpush3.bf16.msra.mxu0 %v372_v3  ;;  %v384_v12 = vpack.c.bf16 %v194_v11, %v193_v9  ;;  %v196_v14 = vld [vmem:[#allocation9 + $0x28] sm:$0xff]  ;;  %v93_v16 = vld [vmem:[#allocation3 + $0x8] sm:$0xff]  ;;  %v320_v21 = vld [vmem:[#allocation8] ss:$0 sm:$0xff]  ;;  %p516_p12 = scmp.ne.s32.totalorder %s307_s3, %s515_s21  ;;  %p521_p0 = scmp.lt.s32.totalorder %s515_s21, %s515_s21 }
  0x60   :  { %377 = vmatprep.subr.bf16.mxu0 %v376_v6  ;;  %v388_v15 = vpack.c.bf16 %v196_v14, %v195_v13  ;;  %v197_v17 = vld [vmem:[#allocation9 + $0x30] sm:$0xff]  ;;  %v325_v34 = vld [vmem:[#allocation11] ss:$0 sm:$0xff] }
  0x61   :  { %381 = vmatprep.subr.bf16.mxu1 %v380_v10  ;;  %v392_v19 = vpack.c.bf16 %v198_v18, %v197_v17  ;;  %p522_p1 = por %p521_p0, %p520_p13 }
  0x62   :  { %383 = vmatpush3.bf16.msra.mxu1 %v380_v10 }
  0x63   :  { %385 = vmatprep.subr.bf16.mxu1 %v384_v12  ;;  %379 = vmatpush3.bf16.msra.mxu0 %v376_v6  ;;  %v190_v28 = vld [vmem:[#allocation2 + $0x8] sm:$0xff]  ;;  %p523_p2 = pnand %p522_p1, %p516_p12 }
  0x64   :  { %v189_v29 = vld [vmem:[#allocation2] sm:$0xff] }
  0x66   :  { %387 = vmatpush3.bf16.msra.mxu1 %v384_v12  ;;  %351 = vmatmul.mubr.msk.f32.vlgmr.msra.gmra.mrb[0].mxu0 %vm89_vm0, %v93_v16 }
  0x67   :  { %389 = vmatprep.subr.bf16.mxu1 %v388_v15 }
  0x6a   :  { %391 = vmatpush3.bf16.msra.mxu1 %v388_v15 }
  0x6b   :  { %393 = vmatprep.subr.bf16.mxu1 %v392_v19 }
  0x6e   :  { %395 = vmatpush3.bf16.msra.mxu1 %v392_v19 }
 0x139   :  { %v352_v22 = vpop.f32.mrb[0].mxu0 }
 0x13a   :  { %v184_v23 = vadd.f32 %v352_v22, %v320_v21  ;;  %v178_v24 = vpop.f32.mrb[1].mxu0 }
 0x13b   :  { %v179_v25 = vadd.f32 %v320_v21, %v178_v24 }
 0x13c   :  { %v188_v27 = vmax.f32 %v184_v23, 0.0 }
 0x13d   :  { %v187_v26 = vmax.f32 %v179_v25, 0.0 }
 0x13f   :  { %369 = vmatprep.mubr.msk.f32.mxu1 %vm199_vm1, %v187_v26 }
 0x140   :  { %370 = vmatmul.mubr.msk.f32.vlgmr.msra.gmra.mrb[0].mxu1 %vm199_vm1, %v188_v27 }
 0x213   :  { %v371_v30 = vpop.f32.mrb[0].mxu1 }
 0x214   :  { %v282_v31 = vadd.f32 %v371_v30, %v190_v28  ;;  %v272_v32 = vpop.f32.mrb[1].mxu1 }
 0x215   :  { %v281_v33 = vadd.f32 %v272_v32, %v189_v29 }
 0x216   :  { %284 = vst.msk [vmem:[#allocation2 + $0x8] sm:$0xff] %vm89_vm0, %v282_v31 }
 0x217   :  { %283 = vst.msk [vmem:[#allocation2] sm:$0xff] %vm89_vm0, %v281_v33 }
 0x21d   :  { %v289_v35 = vld [vmem:[#allocation2 + $0x8] sm:$0xff] }
 0x21e   :  { %v288_v36 = vld [vmem:[#allocation2] sm:$0xff]  ;;  %v298_v37 = vadd.f32 %v325_v34, %v289_v35 }
 0x21f   :  { %v297_v38 = vadd.f32 %v325_v34, %v288_v36 }
 0x220   :  { %300 = vst.msk [vmem:[#allocation12 + $0x8] sm:$0xff] %vm89_vm0, %v298_v37 }
 0x221   :  { %299 = vst.msk [vmem:[#allocation12] sm:$0xff] %vm89_vm0, %v297_v38 }
 0x222   :  { %526 = shalt.err (!%p523_p2)
}
 0x223   :  { %s527_s9 = scalar_lea.hbm %s688_s5, 256 }
 0x224   :  { %p528_p3 = scmp.ne.s32.totalorder %s688_s5, %s527_s9  ;;  %p531_p4 = scmp.lt.u32.totalorder %s527_s9, %s688_s5 }
 0x226   :  { %p533_p5 = pnand %p531_p4, %p528_p3 }
 0x228   :  { %536 = shalt.err (!%p533_p5)
}
 0x229   :  { %312 = dma.vmem_to_hbm [thread:$0]  %s307_s3, 256, %s688_s5, [#allocation5], %s547_s30, %s547_s30, %s548_s6  }
 0x22a   :  { %543 = dma.done.wait [#allocation5], 256  }
 0x22b   :  { %544 = vsyncadd [#allocation5], 4294967040 }
 0x22c   :  { %316 = vsyncpa [#allocation4], 1 }
 0x22d   :  { %317 = vsyncpa [#allocation7], 1 }
 0x22e   :  { %318 = vsyncpa [#allocation10], 1 }
 0x22f   :  { %319 = vsyncpa [#allocation5], 1 }

</bundles_post_ra>
